<compile_context>
chip_gen: v6e
topology: v6e:2x2x1
jax: 0.10.0
libtpu: 0.0.40
codegen_flags: <defaults>
</compile_context>

<pallas_src>
import jax
import jax.numpy as jnp
from jax.experimental import pallas as pl
from jax.experimental.pallas import tpu as pltpu


def _round_up(x, m):
    return (x + m - 1) // m * m


def _round_down(x, m):
    return x // m * m


def _make_fusion_kernel(nx, feat_block_channels, use_weight):
    """Kernel over 2-D (channels, spatial_tile) refs; batch dim is squeezed out.

    feat_block_channels[i] = number of channels actually present in feature block i
    (may be < the feature's full channel count when na > nx, or < nx when na < nx).
    """
    n_feats = len(feat_block_channels)

    def kernel(*refs):
        i0 = 1 if use_weight else 0
        w_ref = refs[0] if use_weight else None          # (n,) f32 in SMEM
        x_ref = refs[i0]                                  # (nx, thw)
        a_refs = refs[i0 + 1: i0 + 1 + n_feats]           # (cb_i, thw) each
        out_ref = refs[i0 + 1 + n_feats]                  # (nx, thw)

        # Value-space accumulation (no VMEM scratch): stream x + a1 + ... -> out.
        acc = x_ref[...].astype(jnp.float32)
        if use_weight:
            acc = acc * w_ref[0]

        for i, (a_ref, cb) in enumerate(zip(a_refs, feat_block_channels)):
            a = a_ref[...].astype(jnp.float32)
            if use_weight:
                a = a * w_ref[i + 1]
            if cb == nx:
                acc = acc + a
            elif cb > nx:
                # Block still slightly wider than nx (nx not a sublane multiple):
                # drop the trailing channels in vregs (static slice).
                acc = acc + a[:nx, :]
            else:
                # Fused map is narrower: add into the leading cb channels only.
                acc = jnp.concatenate([acc[:cb, :] + a, acc[cb:, :]], axis=0)

        out_ref[...] = acc.astype(out_ref.dtype)

    return kernel


def _vmem_budget_bytes():
    """(double-buffered block budget, vmem_limit_bytes) for the current generation."""
    vmem_cap = 64 * 1024 * 1024  # conservative default (v7x per-TC VMEM)
    try:
        vmem_cap = int(pltpu.get_tpu_info().vmem_capacity_bytes)
    except Exception:
        pass
    if vmem_cap >= 100 * 1024 * 1024:
        # v5e / v6e: 128 MiB physical VMEM -> large tiles to amortize per-step overhead.
        return 40 * 1024 * 1024, 64 * 1024 * 1024
    # v7x: 64 MiB per TensorCore -> keep headroom for double-buffering of every block.
    return 20 * 1024 * 1024, 44 * 1024 * 1024


def _choose_hw_tile(hw, nx, feat_block_channels, x_itemsize, feat_itemsizes,
                    out_itemsize, block_budget):
    """Largest 128-multiple spatial tile whose double-buffered working set fits budget."""
    # Bytes per lane column for one copy of every block (x + out + all feature blocks).
    per_col = nx * x_itemsize + nx * out_itemsize + sum(
        cb * isz for cb, isz in zip(feat_block_channels, feat_itemsizes))
    thw = _round_down(block_budget // (2 * per_col), 128)   # 2x: pipeline double-buffer
    if hw < 128:
        return hw                                           # full extent satisfies lane rule
    max_thw = hw if hw % 128 == 0 else _round_down(hw, 128)  # ragged tail handled by cdiv grid
    return int(max(128, min(max_thw, thw)))


def weighted_feature_fusion(x, feats, w=None, donate_x=False):
    """x: (N, Cx, H, W); feats: list of (N, Ci, H, W); w: optional (len(feats)+1,) weights.

    donate_x: alias x to the output (only safe if the caller no longer needs x).
    """
    n_b, nx, h, wd = x.shape
    hw = h * wd
    in_channels = tuple(int(f.shape[1]) for f in feats)
    use_weight = w is not None

    # H*W onto the lane axis (contiguous reshape -> lane-dense, full-width loads/stores).
    x2 = x.reshape(n_b, nx, hw)
    feats2 = [f.reshape(f.shape[0], f.shape[1], hw) for f in feats]

    # Channels actually DMA'd per feature block: never more than round_up(nx, 8)
    # (sublane-aligned), so maps wider than x don't waste HBM bandwidth.
    nx8 = _round_up(nx, 8)
    feat_block_channels = tuple(c if c <= nx else min(c, nx8) for c in in_channels)

    block_budget, vmem_limit = _vmem_budget_bytes()
    thw = _choose_hw_tile(
        hw, nx, feat_block_channels,
        jnp.dtype(x.dtype).itemsize,
        [jnp.dtype(f.dtype).itemsize for f in feats],
        jnp.dtype(x.dtype).itemsize,
        block_budget,
    )
    # TODO(synk): add an optional channel grid axis for very deep layers where even a
    # 128-wide spatial tile exceeds the VMEM budget (split at the na boundary).
    grid = (n_b, pl.cdiv(hw, thw))

    kernel = _make_fusion_kernel(nx, feat_block_channels, use_weight)

    x_spec = pl.BlockSpec((None, nx, thw), lambda b, t: (b, 0, t))
    feat_specs = [pl.BlockSpec((None, cb, thw), lambda b, t: (b, 0, t))
                  for cb in feat_block_channels]
    out_spec = pl.BlockSpec((None, nx, thw), lambda b, t: (b, 0, t))

    in_specs = []
    args = []
    if use_weight:
        in_specs.append(pl.BlockSpec(memory_space=pltpu.MemorySpace.SMEM))
        args.append(jnp.asarray(w, jnp.float32))
    x_arg_idx = len(args)
    in_specs.append(x_spec)
    args.append(x2)
    in_specs.extend(feat_specs)
    args.extend(feats2)

    io_aliases = {x_arg_idx: 0} if donate_x else {}

    out_flat = pl.pallas_call(
        kernel,
        out_shape=jax.ShapeDtypeStruct((n_b, nx, hw), x.dtype),
        grid_spec=pltpu.PrefetchScalarGridSpec(
            num_scalar_prefetch=0,
            grid=grid,
            in_specs=in_specs,
            out_specs=out_spec,
        ),
        input_output_aliases=io_aliases,
        compiler_params=pltpu.CompilerParams(
            dimension_semantics=("parallel", "parallel"),
            vmem_limit_bytes=int(vmem_limit),
        ),
    )(*args)
    return out_flat.reshape(n_b, nx, h, wd)


class WeightedFeatureFusion:
    """JAX/Pallas port of the PyTorch WeightedFeatureFusion module."""

    def __init__(self, layers, weight=False):
        self.layers = layers
        self.weight = weight
        self.n = len(layers) + 1
        if weight:
            self.w = jnp.zeros((self.n,), jnp.float32)   # nn.Parameter equivalent

    def __call__(self, x, outputs):
        feats = [outputs[i] for i in self.layers]
        w = jax.nn.sigmoid(self.w) * (2.0 / self.n) if self.weight else None
        return weighted_feature_fusion(x, feats, w)


def _ref_fusion(x, outputs, layers, w_param=None):
    """Pure-jnp mirror of the PyTorch forward (for correctness checking)."""
    n = len(layers) + 1
    if w_param is not None:
        w = jax.nn.sigmoid(w_param) * (2.0 / n)
        x = x * w[0]
    nx = x.shape[1]
    for i, li in enumerate(layers):
        a = outputs[li] * w[i + 1] if w_param is not None else outputs[li]
        na = a.shape[1]
        if nx == na:
            x = x + a
        elif nx > na:
            x = x.at[:, :na].add(a)
        else:
            x = x + a[:, :nx]
    return x


if __name__ == "__main__":
    key = jax.random.PRNGKey(0)
    kx, k0, k1, k2, k3, kw = jax.random.split(key, 6)

    n = 2

    # --- lane-aligned spatial (16x16): same / fewer / more / much-wider channel cases ---
    h, w_sp = 16, 16
    x = jax.random.normal(kx, (n, 6, h, w_sp), dtype=jnp.float32)
    outputs = [
        jax.random.normal(k0, (n, 6, h, w_sp), dtype=jnp.float32),    # nx == na
        jax.random.normal(k1, (n, 4, h, w_sp), dtype=jnp.float32),    # nx > na (partial add)
        jax.random.normal(k2, (n, 8, h, w_sp), dtype=jnp.float32),    # nx < na (full block)
        jax.random.normal(k3, (n, 16, h, w_sp), dtype=jnp.float32),   # nx < na (trimmed DMA)
    ]
    layers = [0, 1, 2, 3]

    # unweighted fusion (weight=False)
    mod = WeightedFeatureFusion(layers=layers, weight=False)
    out = jax.block_until_ready(mod(x, outputs))
    ref = _ref_fusion(x, outputs, layers, None)
    assert out.shape == ref.shape == (n, 6, h, w_sp)
    assert jnp.allclose(out, ref, atol=1e-5, rtol=1e-5), "unweighted fusion mismatch"

    # weighted fusion (weight=True)
    modw = WeightedFeatureFusion(layers=layers, weight=True)
    modw.w = jax.random.normal(kw, (modw.n,), dtype=jnp.float32)      # non-trivial weights
    outw = jax.block_until_ready(modw(x, outputs))
    refw = _ref_fusion(x, outputs, layers, modw.w)
    assert jnp.allclose(outw, refw, atol=1e-5, rtol=1e-5), "weighted fusion mismatch"

    # --- non-128-multiple spatial (13x13, real YOLO head size): ragged lane tiling ---
    h2, w2 = 13, 13
    x13 = jax.random.normal(kx, (n, 6, h2, w2), dtype=jnp.float32)
    outs13 = [
        jax.random.normal(k0, (n, 6, h2, w2), dtype=jnp.float32),
        jax.random.normal(k1, (n, 4, h2, w2), dtype=jnp.float32),
        jax.random.normal(k2, (n, 16, h2, w2), dtype=jnp.float32),
    ]
    layers13 = [0, 1, 2]
    out13 = jax.block_until_ready(
        WeightedFeatureFusion(layers13, weight=False)(x13, outs13))
    ref13 = _ref_fusion(x13, outs13, layers13, None)
    assert jnp.allclose(out13, ref13, atol=1e-5, rtol=1e-5), "ragged spatial fusion mismatch"

    print("KERNEL_OK")
</pallas_src>

<mosaic_0001>
module attributes {stable_mosaic.version = 11 : i64} {
  func.func @kernel(%arg0: i32, %arg1: i32, %arg2: memref<1x6x256xf32, #tpu.memory_space<vmem>>, %arg3: memref<1x6x256xf32, #tpu.memory_space<vmem>>, %arg4: memref<1x4x256xf32, #tpu.memory_space<vmem>>, %arg5: memref<1x8x256xf32, #tpu.memory_space<vmem>>, %arg6: memref<1x8x256xf32, #tpu.memory_space<vmem>>, %arg7: memref<1x6x256xf32, #tpu.memory_space<vmem>>) attributes {dimension_semantics = [#tpu.dimension_semantics<parallel>, #tpu.dimension_semantics<parallel>], iteration_bounds = array<i64: 2, 1>, scalar_prefetch = 0 : i64, scratch_operands = 0 : i64, tpu.core_type = #tpu.core_type<tc>, window_params = [{transform_indices = @transform_0, window_bounds = array<i64: 1, 6, 256>}, {transform_indices = @transform_1, window_bounds = array<i64: 1, 6, 256>}, {transform_indices = @transform_2, window_bounds = array<i64: 1, 4, 256>}, {transform_indices = @transform_3, window_bounds = array<i64: 1, 8, 256>}, {transform_indices = @transform_4, window_bounds = array<i64: 1, 8, 256>}, {transform_indices = @transform_5, window_bounds = array<i64: 1, 6, 256>}]} {
    %c0 = arith.constant 0 : index
    %c0_0 = arith.constant 0 : index
    %c0_1 = arith.constant 0 : index
    %0 = vector.load %arg2[%c0, %c0_0, %c0_1] : memref<1x6x256xf32, #tpu.memory_space<vmem>>, vector<1x6x256xf32>
    %1 = vector.shape_cast %0 : vector<1x6x256xf32> to vector<6x256xf32>
    %c0_2 = arith.constant 0 : index
    %c0_3 = arith.constant 0 : index
    %c0_4 = arith.constant 0 : index
    %2 = vector.load %arg3[%c0_2, %c0_3, %c0_4] : memref<1x6x256xf32, #tpu.memory_space<vmem>>, vector<1x6x256xf32>
    %3 = vector.shape_cast %2 : vector<1x6x256xf32> to vector<6x256xf32>
    %4 = arith.addf %1, %3 : vector<6x256xf32>
    %c0_5 = arith.constant 0 : index
    %c0_6 = arith.constant 0 : index
    %c0_7 = arith.constant 0 : index
    %5 = vector.load %arg4[%c0_5, %c0_6, %c0_7] : memref<1x4x256xf32, #tpu.memory_space<vmem>>, vector<1x4x256xf32>
    %6 = vector.shape_cast %5 : vector<1x4x256xf32> to vector<4x256xf32>
    %7 = vector.extract_strided_slice %4 {offsets = [0, 0], sizes = [4, 256], strides = [1, 1]} : vector<6x256xf32> to vector<4x256xf32>
    %8 = arith.addf %7, %6 : vector<4x256xf32>
    %9 = vector.extract_strided_slice %4 {offsets = [4, 0], sizes = [2, 256], strides = [1, 1]} : vector<6x256xf32> to vector<2x256xf32>
    %10 = tpu.concatenate %8, %9 in 0 : vector<4x256xf32>, vector<2x256xf32> -> vector<6x256xf32>
    %c0_8 = arith.constant 0 : index
    %c0_9 = arith.constant 0 : index
    %c0_10 = arith.constant 0 : index
    %11 = vector.load %arg5[%c0_8, %c0_9, %c0_10] : memref<1x8x256xf32, #tpu.memory_space<vmem>>, vector<1x8x256xf32>
    %12 = vector.shape_cast %11 : vector<1x8x256xf32> to vector<8x256xf32>
    %13 = vector.extract_strided_slice %12 {offsets = [0, 0], sizes = [6, 256], strides = [1, 1]} : vector<8x256xf32> to vector<6x256xf32>
    %14 = arith.addf %10, %13 : vector<6x256xf32>
    %c0_11 = arith.constant 0 : index
    %c0_12 = arith.constant 0 : index
    %c0_13 = arith.constant 0 : index
    %15 = vector.load %arg6[%c0_11, %c0_12, %c0_13] : memref<1x8x256xf32, #tpu.memory_space<vmem>>, vector<1x8x256xf32>
    %16 = vector.shape_cast %15 : vector<1x8x256xf32> to vector<8x256xf32>
    %17 = vector.extract_strided_slice %16 {offsets = [0, 0], sizes = [6, 256], strides = [1, 1]} : vector<8x256xf32> to vector<6x256xf32>
    %18 = arith.addf %14, %17 : vector<6x256xf32>
    %c0_14 = arith.constant 0 : index
    %c0_15 = arith.constant 0 : index
    %c0_16 = arith.constant 0 : index
    %19 = vector.load %arg7[%c0_14, %c0_15, %c0_16] : memref<1x6x256xf32, #tpu.memory_space<vmem>>, vector<1x6x256xf32>
    %20 = vector.shape_cast %19 : vector<1x6x256xf32> to vector<6x256xf32>
    %21 = vector.shape_cast %18 : vector<6x256xf32> to vector<1x6x256xf32>
    tpu.vector_store %arg7[%c0_14, %c0_15, %c0_16], %21 {strides = array<i32>} : memref<1x6x256xf32, #tpu.memory_space<vmem>>, vector<1x6x256xf32>,
    return
  }
  func.func @transform_0(%arg0: i32, %arg1: i32) -> (i32, i32, i32) {
    %c0_i32 = arith.constant 0 : i32
    %c0_i32_0 = arith.constant 0 : i32
    return %arg0, %c0_i32, %arg1 : i32, i32, i32
  }
  func.func @transform_1(%arg0: i32, %arg1: i32) -> (i32, i32, i32) {
    %c0_i32 = arith.constant 0 : i32
    %c0_i32_0 = arith.constant 0 : i32
    return %arg0, %c0_i32, %arg1 : i32, i32, i32
  }
  func.func @transform_2(%arg0: i32, %arg1: i32) -> (i32, i32, i32) {
    %c0_i32 = arith.constant 0 : i32
    %c0_i32_0 = arith.constant 0 : i32
    return %arg0, %c0_i32, %arg1 : i32, i32, i32
  }
  func.func @transform_3(%arg0: i32, %arg1: i32) -> (i32, i32, i32) {
    %c0_i32 = arith.constant 0 : i32
    %c0_i32_0 = arith.constant 0 : i32
    return %arg0, %c0_i32, %arg1 : i32, i32, i32
  }
  func.func @transform_4(%arg0: i32, %arg1: i32) -> (i32, i32, i32) {
    %c0_i32 = arith.constant 0 : i32
    %c0_i32_0 = arith.constant 0 : i32
    return %arg0, %c0_i32, %arg1 : i32, i32, i32
  }
  func.func @transform_5(%arg0: i32, %arg1: i32) -> (i32, i32, i32) {
    %c0_i32 = arith.constant 0 : i32
    %c0_i32_0 = arith.constant 0 : i32
    return %arg0, %c0_i32, %arg1 : i32, i32, i32
  }
}

</mosaic_0001>

<bundles_post_ra>
// kernel: tpu_custom_call.1
= control target key start
LH: loop header
LB: loop body
LE: loop exit
PB: predicated region body
PF: predicated region fallthrough
CT: control target
= control target key end

     0   :  { %s696_s18 = smov 0   ;;  %s698_s19 = smov 0   ;;  %s741_s0 = inlined_call_operand.vmem [shape: f32[2,6,256], index: 0, kind: input, shape index: {}]   ;;  %s742_s1 = inlined_call_operand.vmem [shape: f32[2,6,256], index: 1, kind: input, shape index: {}]   ;;  %s743_s2 = inlined_call_operand.vmem [shape: f32[2,4,256], index: 2, kind: input, shape index: {}]   ;;  %s744_s3 = inlined_call_operand.vmem [shape: f32[2,8,256], index: 3, kind: input, shape index: {}]   ;;  %s745_s4 = inlined_call_operand.vmem [shape: f32[2,16,256], index: 4, kind: input, shape index: {}]   ;;  %s746_s5 = inlined_call_operand.vmem [shape: f32[2,6,256], index: 5, kind: output, shape index: {}]  }
   0x1   :  { %s700_s20 = smov 0  }
   0x2 LB: > { %s27_s21 = sadd.s32 1, %s660_s19  ;;  %p596_p0 = scmp.ge.s32.totalorder %s664_s20, 1  ;;  %s664_s20 = sphi %s700_s20, %s15_s20   ;;  %s660_s19 = sphi %s698_s19, %s748_s19   ;;  %s656_s18 = sphi %s696_s18, %s747_s18  }
   0x3   : > { %p29_p1 = scmp.ge.s32.totalorder %s27_s21, 2  ;;  %p276_p2 = scmp.lt.s32.totalorder %s664_s20, 3 }
   0x5   : > { %s750_s21 = smov (%p29_p1, %s27_s21), 0  ;;  %p277_p3 = pnand %p596_p0, %p276_p2 }
   0x6   : > { %p349_p4 = scmp.lt.s32.totalorder (!%p277_p3), %s656_s18, 1 }
   0x7   : > { %280 = sbr.rel (%p277_p3) target bundleno = 28 (0x1c), region = 40 }
   0xc   : > { %s752_s18 = smov (!%p349_p4, %s656_s18), 1  ;;  %vm420_vm0 = vcmask 1043456  }
   0xd   : > { %s611_s22 = sshll.u32 %s752_s18, 4  ;;  %s613_s23 = sshll.u32 %s752_s18, 3 }
   0xe   : > { %s356_s26 = scalar_lea.vmem %s741_s0, %s611_s22  ;;  %s366_s29 = scalar_lea.vmem %s742_s1, %s611_s22 }
   0xf   : > { %s376_s7 = scalar_lea.vmem %s743_s2, %s613_s23  ;;  %s386_s10 = scalar_lea.vmem %s744_s3, %s611_s22  ;;  %v408_v0 = vld [vmem:[%s356_s26] sm:$0x3f]  ;;  %v409_v1 = vld [vmem:[%s356_s26 + $0x8] sm:$0x3f] }
  0x10   : > { %v410_v2 = vld [vmem:[%s366_s29] sm:$0x3f]  ;;  %s615_s11 = sshll.u32 %s752_s18, 5  ;;  %v411_v3 = vld [vmem:[%s366_s29 + $0x8] sm:$0x3f]  ;;  %s406_s17 = scalar_lea.vmem %s746_s5, %s611_s22 }
  0x11   : > { %v412_v4 = vadd.f32 %v410_v2, %v408_v0  ;;  %v414_v5 = vld [vmem:[%s376_s7] sm:$0xff]  ;;  %s396_s14 = scalar_lea.vmem %s745_s4, %s615_s11  ;;  %v413_v6 = vadd.f32 %v411_v3, %v409_v1  ;;  %v424_v11 = vld [vmem:[%s386_s10 + $0x8] sm:$0xff] }
  0x12   : > { %v416_v7 = vcombine.high %v414_v5, %v414_v5  ;;  %v423_v9 = vld [vmem:[%s386_s10] sm:$0xff]  ;;  %v428_v16 = vld [vmem:[%s396_s14 + $0x8] sm:$0xff] }
  0x13   : > { %v418_v8 = vadd.f32 %v414_v5, %v412_v4  ;;  %v427_v13 = vld [vmem:[%s396_s14] sm:$0xff] }
  0x14   : > { %v419_v10 = vadd.f32 %v416_v7, %v413_v6 }
  0x15   : > { %v421_v12 = vsel %vm420_vm0, %v418_v8, %v412_v4 }
  0x16   : > { %v425_v14 = vadd.f32 %v423_v9, %v421_v12  ;;  %v422_v15 = vsel %vm420_vm0, %v419_v10, %v413_v6 }
  0x17   : > { %v426_v17 = vadd.f32 %v424_v11, %v422_v15 }
  0x18   : > { %v429_v18 = vadd.f32 %v427_v13, %v425_v14 }
  0x19   : > { %v430_v19 = vadd.f32 %v428_v16, %v426_v17 }
  0x1a   : > { %431 = vst [vmem:[%s406_s17] sm:$0x3f] %v429_v18 }
  0x1b   : > { %432 = vst [vmem:[%s406_s17 + $0x8] sm:$0x3f] %v430_v19 }
  0x1c PF: > { %s15_s20 = sadd.s32 1, %s664_s20   ;;  %s747_s18 = smov %s660_s19 }
  0x1d   : > { %p12_p5 = scmp.ge.s32.totalorder %s15_s20, 4   ;;  %s748_s19 = smov %s750_s21 }
  0x1f   :  { %14 = sbr.rel (!%p12_p5) target bundleno = 2 (0x2), region = 82 }

</bundles_post_ra>
